<compile_context>
chip_gen: v7x
topology: tpu7x:2x2x1
jax: 0.10.0
libtpu: 0.0.40
codegen_flags: <defaults>
</compile_context>

<pallas_src>
import math
import functools

import jax
import jax.numpy as jnp
from jax.experimental import pallas as pl
from jax.experimental.pallas import tpu as pltpu


_VMEM_LIMIT = 32 * 1024 * 1024  # raise v5e default (16 MiB); safe on v6e/v7x.


def _round_up(x, m):
    return ((x + m - 1) // m) * m


def _row_tile(n):
    # >=128 rows -> full 128-row tiles; tiny batches -> pad to a sublane group.
    return 128 if n >= 128 else _round_up(max(n, 1), 8)


# ----------------------------------------------------------------------------
# Kernel 1: __S__ forward — embedding extractor (Linear -> ReLU -> Linear)
#   grid = (N_tiles, K_tiles over L);  bf16 matmuls, f32 accumulation.
# ----------------------------------------------------------------------------
def _embed_kernel(x_ref, w1_ref, b1_ref, w2_ref, b2_ref, o_ref, h_acc):
    k = pl.program_id(1)

    @pl.when(k == 0)
    def _():
        h_acc[...] = jnp.zeros_like(h_acc)

    h_acc[...] += jnp.dot(x_ref[...].astype(jnp.bfloat16), w1_ref[...],
                          preferred_element_type=jnp.float32)

    @pl.when(k == pl.num_programs(1) - 1)
    def _():
        h = jnp.maximum(h_acc[...] + b1_ref[...], 0.0).astype(jnp.bfloat16)
        o = jnp.dot(h, w2_ref[...], preferred_element_type=jnp.float32)
        o_ref[...] = (o + b2_ref[...]).astype(o_ref.dtype)


def embed_forward(x, w1, b1, w2, b2):
    N, L = x.shape
    H = w1.shape[1]
    D = w2.shape[1]

    tm = _row_tile(N)
    tk = min(512, _round_up(L, 128))
    N_pad = _round_up(N, tm)
    L_pad = _round_up(L, tk)

    if N_pad != N or L_pad != L:
        x = jnp.pad(x, ((0, N_pad - N), (0, L_pad - L)))
    if L_pad != L:
        w1 = jnp.pad(w1, ((0, L_pad - L), (0, 0)))

    out = pl.pallas_call(
        _embed_kernel,
        out_shape=jax.ShapeDtypeStruct((N_pad, D), jnp.float32),
        grid=(N_pad // tm, L_pad // tk),
        in_specs=[
            pl.BlockSpec((tm, tk), lambda i, k: (i, k)),   # x tile
            pl.BlockSpec((tk, H), lambda i, k: (k, 0)),    # w1 tile (bf16)
            pl.BlockSpec((1, H), lambda i, k: (0, 0)),     # b1
            pl.BlockSpec((H, D), lambda i, k: (0, 0)),     # w2 (bf16)
            pl.BlockSpec((1, D), lambda i, k: (0, 0)),     # b2
        ],
        out_specs=pl.BlockSpec((tm, D), lambda i, k: (i, 0)),
        scratch_shapes=[pltpu.VMEM((tm, H), jnp.float32)],
        compiler_params=pltpu.CompilerParams(
            dimension_semantics=("parallel", "arbitrary"),
            vmem_limit_bytes=_VMEM_LIMIT),
    )(x, w1, b1, w2, b2)
    return out[:N]


# ----------------------------------------------------------------------------
# Kernel 2a: pre-pass — L2-normalize class weights once per step, emit bf16.
# ----------------------------------------------------------------------------
def _wnorm_kernel(w_ref, o_ref):
    w = w_ref[...]
    inv = jax.lax.rsqrt(jnp.sum(w * w, axis=-1, keepdims=True) + 1e-12)
    o_ref[...] = (w * inv).astype(jnp.bfloat16)


def normalize_rows_bf16(w, tc):
    C, D = w.shape
    return pl.pallas_call(
        _wnorm_kernel,
        out_shape=jax.ShapeDtypeStruct((C, D), jnp.bfloat16),
        grid=(C // tc,),
        in_specs=[pl.BlockSpec((tc, D), lambda i: (i, 0))],
        out_specs=pl.BlockSpec((tc, D), lambda i: (i, 0)),
        compiler_params=pltpu.CompilerParams(
            dimension_semantics=("parallel",),
            vmem_limit_bytes=_VMEM_LIMIT),
    )(w)


# ----------------------------------------------------------------------------
# Kernel 2b: __L__ forward — AAM-Softmax loss + top-1 precision.
#   grid = (N_tiles, C_tiles); online LSE + running argmax in VMEM scratch.
# ----------------------------------------------------------------------------
def _aam_kernel(emb_ref, wn_ref, label_ref, loss_ref, corr_ref,
                xn_s, m_s, s_s, t_s, bv_s, bi_s,
                *, scale, cos_m, sin_m, th, mm, n_classes, n_valid, tm, tc):
    i = pl.program_id(0)
    c = pl.program_id(1)

    @pl.when(c == 0)
    def _():
        # Normalize the embedding tile once; reuse (bf16) for every C tile.
        x = emb_ref[...]
        xn = x * jax.lax.rsqrt(jnp.sum(x * x, axis=-1, keepdims=True) + 1e-12)
        xn_s[...] = xn.astype(jnp.bfloat16)
        m_s[...] = jnp.full_like(m_s, -jnp.inf)
        s_s[...] = jnp.zeros_like(s_s)
        t_s[...] = jnp.zeros_like(t_s)
        bv_s[...] = jnp.full_like(bv_s, -jnp.inf)
        bi_s[...] = jnp.zeros_like(bi_s)

    # cosine[i, c] = <xn[i], wn[c]>  (bf16 MXU, f32 accumulation)
    cosine = jax.lax.dot_general(xn_s[...], wn_ref[...],
                                 (((1,), (1,)), ((), ())),
                                 preferred_element_type=jnp.float32)  # (tm, tc)
    sine = jnp.sqrt(jnp.clip(1.0 - cosine * cosine, 0.0, 1.0))
    phi = cosine * cos_m - sine * sin_m
    phi = jnp.where((cosine - th) > 0, phi, cosine - mm)   # easy_margin=False

    label = label_ref[...]                                  # (tm, 1) int32
    cls = c * tc + jax.lax.broadcasted_iota(jnp.int32, cosine.shape, 1)
    onehot = cls == label
    logits = scale * jnp.where(onehot, phi, cosine)
    logits = jnp.where(cls < n_classes, logits, -1e30)      # mask padded classes

    # --- online log-sum-exp over class tiles ---
    tile_max = jnp.max(logits, axis=-1, keepdims=True)
    new_m = jnp.maximum(m_s[...], tile_max)
    alpha = jnp.exp(m_s[...] - new_m)
    s_s[...] = alpha * s_s[...] + jnp.sum(jnp.exp(logits - new_m),
                                          axis=-1, keepdims=True)
    m_s[...] = new_m
    t_s[...] += jnp.sum(jnp.where(onehot, logits, 0.0), axis=-1, keepdims=True)

    # --- running argmax for top-1 precision ---
    is_tile_max = logits == tile_max
    tile_arg = jnp.min(jnp.where(is_tile_max, cls, jnp.int32(2 ** 30)),
                       axis=-1, keepdims=True)
    better = tile_max > bv_s[...]
    bv_s[...] = jnp.where(better, tile_max, bv_s[...])
    bi_s[...] = jnp.where(better, tile_arg, bi_s[...])

    @pl.when(c == pl.num_programs(1) - 1)
    def _():
        row = i * tm + jax.lax.broadcasted_iota(jnp.int32, (tm, 1), 0)
        valid = row < n_valid
        lse = m_s[...] + jnp.log(s_s[...])
        per_row_loss = lse - t_s[...]
        loss_ref[0, 0] = jnp.sum(jnp.where(valid, per_row_loss, 0.0))
        correct = jnp.logical_and(valid, bi_s[...] == label)
        corr_ref[0, 0] = jnp.sum(correct.astype(jnp.float32))


def aamsoftmax_forward(emb, weight, label, scale=30.0, margin=0.2):
    N, D = emb.shape
    C = weight.shape[0]

    tm = _row_tile(N)
    tc = min(512, _round_up(C, 128))
    N_pad = _round_up(N, tm)
    C_pad = _round_up(C, tc)

    if N_pad != N:
        emb = jnp.pad(emb, ((0, N_pad - N), (0, 0)))
    label2 = jnp.pad(label.astype(jnp.int32), (0, N_pad - N)).reshape(N_pad, 1)
    if C_pad != C:
        weight = jnp.pad(weight, ((0, C_pad - C), (0, 0)))

    # Normalize class weights once per call (not per N tile); bf16 handoff.
    wn = normalize_rows_bf16(weight, tc)

    kernel = functools.partial(
        _aam_kernel,
        scale=float(scale),
        cos_m=math.cos(margin),
        sin_m=math.sin(margin),
        th=math.cos(math.pi - margin),
        mm=math.sin(math.pi - margin) * margin,
        n_classes=C, n_valid=N, tm=tm, tc=tc,
    )

    nN = N_pad // tm
    loss_p, corr_p = pl.pallas_call(
        kernel,
        out_shape=(jax.ShapeDtypeStruct((nN, 1), jnp.float32),
                   jax.ShapeDtypeStruct((nN, 1), jnp.float32)),
        grid=(nN, C_pad // tc),
        in_specs=[
            pl.BlockSpec((tm, D), lambda i, c: (i, 0)),   # embeddings (resident)
            pl.BlockSpec((tc, D), lambda i, c: (c, 0)),   # normalized weights
            pl.BlockSpec((tm, 1), lambda i, c: (i, 0)),   # int32 labels
        ],
        out_specs=(pl.BlockSpec((1, 1), lambda i, c: (i, 0)),
                   pl.BlockSpec((1, 1), lambda i, c: (i, 0))),
        scratch_shapes=[
            pltpu.VMEM((tm, D), jnp.bfloat16),   # normalized embedding tile
            pltpu.VMEM((tm, 1), jnp.float32),    # running max
            pltpu.VMEM((tm, 1), jnp.float32),    # running sum-exp
            pltpu.VMEM((tm, 1), jnp.float32),    # target logit
            pltpu.VMEM((tm, 1), jnp.float32),    # best value (argmax)
            pltpu.VMEM((tm, 1), jnp.int32),      # best index (argmax)
        ],
        compiler_params=pltpu.CompilerParams(
            dimension_semantics=("parallel", "arbitrary"),
            vmem_limit_bytes=_VMEM_LIMIT),
    )(emb, wn, label2)

    loss = jnp.sum(loss_p) / N
    prec1 = jnp.sum(corr_p) / N * 100.0
    return loss, prec1


# ----------------------------------------------------------------------------
# SpeakerNet wrapper (mirrors the PyTorch forward semantics)
# ----------------------------------------------------------------------------
class SpeakerNetPallas:
    def __init__(self, n_samples, hidden, embed_dim, n_classes,
                 nPerSpeaker=1, scale=30.0, margin=0.2, seed=0):
        self.nPerSpeaker = nPerSpeaker
        self.scale = scale
        self.margin = margin
        k = jax.random.PRNGKey(seed)
        k1, k2, k3 = jax.random.split(k, 3)
        # __S__ parameters: matmul weights stored bf16 (MXU-native), biases f32.
        self.w1 = (jax.random.normal(k1, (n_samples, hidden), jnp.float32)
                   * 0.05).astype(jnp.bfloat16)
        self.b1 = jnp.zeros((1, hidden), jnp.float32)
        self.w2 = (jax.random.normal(k2, (hidden, embed_dim), jnp.float32)
                   * 0.05).astype(jnp.bfloat16)
        self.b2 = jnp.zeros((1, embed_dim), jnp.float32)
        # __L__ (AAM-Softmax) class-weight parameters (f32 master, bf16 at use).
        self.loss_w = jax.random.normal(k3, (n_classes, embed_dim),
                                        jnp.float32) * 0.05

    def forward(self, data, label=None):
        # data.reshape(-1, data.size()[-1])
        data = data.reshape(-1, data.shape[-1]).astype(jnp.float32)
        outp = embed_forward(data, self.w1, self.b1, self.w2, self.b2)
        if label is None:
            return outp
        # outp.reshape(nPerSpeaker, -1, D).transpose(1, 0).squeeze(1)
        D = outp.shape[-1]
        outp = jnp.transpose(outp.reshape(self.nPerSpeaker, -1, D), (1, 0, 2))
        if outp.shape[1] == 1:
            outp = jnp.squeeze(outp, axis=1)
        nloss, prec1 = aamsoftmax_forward(outp, self.loss_w, label,
                                          scale=self.scale, margin=self.margin)
        return nloss, prec1


# ----------------------------------------------------------------------------
if __name__ == "__main__":
    # Small shapes consistent with the forward: data is (batch, nPerSpeaker, L)
    batch, nPerSpeaker, L = 4, 1, 256
    hidden, embed_dim, n_classes = 128, 128, 256

    key = jax.random.PRNGKey(0)
    kd, kl = jax.random.split(key)
    data = jax.random.normal(kd, (batch, nPerSpeaker, L), jnp.float32)
    label = jax.random.randint(kl, (batch,), 0, n_classes, jnp.int32)

    net = SpeakerNetPallas(n_samples=L, hidden=hidden, embed_dim=embed_dim,
                           n_classes=n_classes, nPerSpeaker=nPerSpeaker)

    # Inference path (label=None): returns embeddings.
    emb = net.forward(data)
    emb = jax.block_until_ready(emb)
    assert emb.shape == (batch * nPerSpeaker, embed_dim)

    # Training path (label given): returns (loss, prec1).
    nloss, prec1 = net.forward(data, label)
    nloss = jax.block_until_ready(nloss)
    prec1 = jax.block_until_ready(prec1)
    assert nloss.shape == () and prec1.shape == ()
    assert bool(jnp.isfinite(nloss)) and bool(jnp.isfinite(prec1))

    print("KERNEL_OK")
</pallas_src>

<mosaic_0001>
module attributes {stable_mosaic.version = 11 : i64} {
  func.func @_embed_kernel(%arg0: i32, %arg1: i32, %arg2: memref<8x256xf32, #tpu.memory_space<vmem>>, %arg3: memref<256x128xbf16, #tpu.memory_space<vmem>>, %arg4: memref<1x128xf32, #tpu.memory_space<vmem>>, %arg5: memref<128x128xbf16, #tpu.memory_space<vmem>>, %arg6: memref<1x128xf32, #tpu.memory_space<vmem>>, %arg7: memref<8x128xf32, #tpu.memory_space<vmem>>, %arg8: memref<8x128xf32, #tpu.memory_space<vmem>>) attributes {dimension_semantics = [#tpu.dimension_semantics<parallel>, #tpu.dimension_semantics<arbitrary>], iteration_bounds = array<i64: 1, 1>, scalar_prefetch = 0 : i64, scratch_operands = 1 : i64, tpu.core_type = #tpu.core_type<tc>, window_params = [{transform_indices = @transform_0, window_bounds = array<i64: 8, 256>}, {transform_indices = @transform_1, window_bounds = array<i64: 256, 128>}, {pipeline_mode = #tpu.pipeline_mode<synchronous>, transform_indices = @transform_2, window_bounds = array<i64: 1, 128>}, {pipeline_mode = #tpu.pipeline_mode<synchronous>, transform_indices = @transform_3, window_bounds = array<i64: 128, 128>}, {pipeline_mode = #tpu.pipeline_mode<synchronous>, transform_indices = @transform_4, window_bounds = array<i64: 1, 128>}, {transform_indices = @transform_5, window_bounds = array<i64: 8, 128>}]} {
    %c0_i32 = arith.constant 0 : i32
    %0 = arith.cmpi eq, %arg1, %c0_i32 : i32
    %1 = arith.extui %0 : i1 to i32
    %c0_i32_0 = arith.constant 0 : i32
    %2 = arith.cmpi ne, %1, %c0_i32_0 : i32
    scf.if %2 {
      %cst_10 = arith.constant 0.000000e+00 : f32
      %13 = vector.broadcast %cst_10 : f32 to vector<8x128xf32>
      %c0_11 = arith.constant 0 : index
      %c0_12 = arith.constant 0 : index
      %14 = vector.load %arg8[%c0_11, %c0_12] : memref<8x128xf32, #tpu.memory_space<vmem>>, vector<8x128xf32>
      tpu.vector_store %arg8[%c0_11, %c0_12], %13 {strides = array<i32>} : memref<8x128xf32, #tpu.memory_space<vmem>>, vector<8x128xf32>,
    } else {
    }
    %c0 = arith.constant 0 : index
    %c0_1 = arith.constant 0 : index
    %3 = vector.load %arg8[%c0, %c0_1] : memref<8x128xf32, #tpu.memory_space<vmem>>, vector<8x128xf32>
    %c0_2 = arith.constant 0 : index
    %c0_3 = arith.constant 0 : index
    %4 = vector.load %arg2[%c0_2, %c0_3] : memref<8x256xf32, #tpu.memory_space<vmem>>, vector<8x256xf32>
    %5 = arith.truncf %4 : vector<8x256xf32> to vector<8x256xbf16>
    %c0_4 = arith.constant 0 : index
    %c0_5 = arith.constant 0 : index
    %6 = vector.load %arg3[%c0_4, %c0_5] : memref<256x128xbf16, #tpu.memory_space<vmem>>, vector<256x128xbf16>
    %cst = arith.constant dense<0.000000e+00> : vector<8x128xf32>
    %7 = tpu.matmul %5, %6, %cst {dimension_numbers = #tpu.dot_dimension_numbers<[1], [0], [0], [1], [0, 0, 1, 1], [], []>} : vector<8x256xbf16>, vector<256x128xbf16>, vector<8x128xf32> -> vector<8x128xf32>
    %8 = arith.addf %3, %7 : vector<8x128xf32>
    %c0_6 = arith.constant 0 : index
    %c0_7 = arith.constant 0 : index
    %9 = vector.load %arg8[%c0_6, %c0_7] : memref<8x128xf32, #tpu.memory_space<vmem>>, vector<8x128xf32>
    tpu.vector_store %arg8[%c0_6, %c0_7], %8 {strides = array<i32>} : memref<8x128xf32, #tpu.memory_space<vmem>>, vector<8x128xf32>,
    %c0_i32_8 = arith.constant 0 : i32
    %10 = arith.cmpi eq, %arg1, %c0_i32_8 : i32
    %11 = arith.extui %10 : i1 to i32
    %c0_i32_9 = arith.constant 0 : i32
    %12 = arith.cmpi ne, %11, %c0_i32_9 : i32
    scf.if %12 {
      %c0_10 = arith.constant 0 : index
      %c0_11 = arith.constant 0 : index
      %13 = vector.load %arg8[%c0_10, %c0_11] : memref<8x128xf32, #tpu.memory_space<vmem>>, vector<8x128xf32>
      %c0_12 = arith.constant 0 : index
      %c0_13 = arith.constant 0 : index
      %14 = vector.load %arg4[%c0_12, %c0_13] : memref<1x128xf32, #tpu.memory_space<vmem>>, vector<1x128xf32>
      %15 = vector.broadcast %14 : vector<1x128xf32> to vector<8x128xf32>
      %16 = arith.addf %13, %15 : vector<8x128xf32>
      %cst_14 = arith.constant 0.000000e+00 : f32
      %17 = vector.broadcast %cst_14 : f32 to vector<8x128xf32>
      %18 = arith.maximumf %16, %17 : vector<8x128xf32>
      %19 = arith.truncf %18 : vector<8x128xf32> to vector<8x128xbf16>
      %c0_15 = arith.constant 0 : index
      %c0_16 = arith.constant 0 : index
      %20 = vector.load %arg5[%c0_15, %c0_16] : memref<128x128xbf16, #tpu.memory_space<vmem>>, vector<128x128xbf16>
      %cst_17 = arith.constant dense<0.000000e+00> : vector<8x128xf32>
      %21 = tpu.matmul %19, %20, %cst_17 {dimension_numbers = #tpu.dot_dimension_numbers<[1], [0], [0], [1], [0, 0, 1, 1], [], []>} : vector<8x128xbf16>, vector<128x128xbf16>, vector<8x128xf32> -> vector<8x128xf32>
      %c0_18 = arith.constant 0 : index
      %c0_19 = arith.constant 0 : index
      %22 = vector.load %arg6[%c0_18, %c0_19] : memref<1x128xf32, #tpu.memory_space<vmem>>, vector<1x128xf32>
      %23 = vector.broadcast %22 : vector<1x128xf32> to vector<8x128xf32>
      %24 = arith.addf %21, %23 : vector<8x128xf32>
      %c0_20 = arith.constant 0 : index
      %c0_21 = arith.constant 0 : index
      %25 = vector.load %arg7[%c0_20, %c0_21] : memref<8x128xf32, #tpu.memory_space<vmem>>, vector<8x128xf32>
      tpu.vector_store %arg7[%c0_20, %c0_21], %24 {strides = array<i32>} : memref<8x128xf32, #tpu.memory_space<vmem>>, vector<8x128xf32>,
    } else {
    }
    return
  }
  func.func @transform_0(%arg0: i32, %arg1: i32) -> (i32, i32) {
    %c0_i32 = arith.constant 0 : i32
    return %arg0, %arg1 : i32, i32
  }
  func.func @transform_1(%arg0: i32, %arg1: i32) -> (i32, i32) {
    %c0_i32 = arith.constant 0 : i32
    %c0_i32_0 = arith.constant 0 : i32
    return %arg1, %c0_i32 : i32, i32
  }
  func.func @transform_2(%arg0: i32, %arg1: i32) -> (i32, i32) {
    %c0_i32 = arith.constant 0 : i32
    %c0_i32_0 = arith.constant 0 : i32
    %c0_i32_1 = arith.constant 0 : i32
    return %c0_i32, %c0_i32_0 : i32, i32
  }
  func.func @transform_3(%arg0: i32, %arg1: i32) -> (i32, i32) {
    %c0_i32 = arith.constant 0 : i32
    %c0_i32_0 = arith.constant 0 : i32
    %c0_i32_1 = arith.constant 0 : i32
    return %c0_i32, %c0_i32_0 : i32, i32
  }
  func.func @transform_4(%arg0: i32, %arg1: i32) -> (i32, i32) {
    %c0_i32 = arith.constant 0 : i32
    %c0_i32_0 = arith.constant 0 : i32
    %c0_i32_1 = arith.constant 0 : i32
    return %c0_i32, %c0_i32_0 : i32, i32
  }
  func.func @transform_5(%arg0: i32, %arg1: i32) -> (i32, i32) {
    %c0_i32 = arith.constant 0 : i32
    %c0_i32_0 = arith.constant 0 : i32
    return %arg0, %c0_i32 : i32, i32
  }
}

</mosaic_0001>

<bundles_post_ra>
// kernel: tpu_custom_call.1
= control target key start
LH: loop header
LB: loop body
LE: loop exit
PB: predicated region body
PF: predicated region fallthrough
CT: control target
= control target key end

     0   :  { %10 = vsyncpa [#allocation4], 0  ;;  %s693_s0 = inlined_call_operand.hbm [shape: f32[8,256], index: 0, kind: input, shape index: {}]   ;;  %s694_s1 = inlined_call_operand.hbm [shape: bf16[256,128], index: 1, kind: input, shape index: {}]   ;;  %s695_s2 = inlined_call_operand.vmem [shape: f32[1,128], index: 2, kind: input, shape index: {}]   ;;  %s696_s3 = inlined_call_operand.hbm [shape: bf16[128,128], index: 3, kind: input, shape index: {}]   ;;  %s697_s4 = inlined_call_operand.vmem [shape: f32[1,128], index: 4, kind: input, shape index: {}]   ;;  %s698_s5 = inlined_call_operand.hbm [shape: f32[8,128], index: 5, kind: output, shape index: {}]  }
   0x1   :  { %11 = vsyncpa [#allocation7], 0 }
   0x2   :  { %12 = vsyncpa [#allocation5], 0  ;;  %s586_s18 = smov [#allocation6]   ;;  %s492_s22 = scalar_lea.hbm %s694_s1, 2048 }
   0x3   :  { %s28_s19 = sshll.u32 %s586_s18, 4  ;;  %p493_p0 = scmp.ne.s32.totalorder %s694_s1, %s492_s22  ;;  %s29_s19 = int_to_ptr.vmem [resolvable:$true] %s28_s19 }
   0x4   :  { %p496_p1 = scmp.lt.u32.totalorder %s492_s22, %s694_s1 }
   0x6   :  { %p498_p2 = pnand %p496_p1, %p493_p0 }
   0x8   :  { %501 = shalt.err (!%p498_p2)
}
   0x9   :  { %s502_s27 = scalar_lea.vmem %s29_s19, 2048  ;;  %p507_p4 = scmp.lt.s32.totalorder %s29_s19, %s29_s19 }
   0xa   :  { %p503_p3 = scmp.ne.s32.totalorder %s29_s19, %s502_s27  ;;  %p508_p5 = scmp.lt.s32.totalorder %s502_s27, %s502_s27 }
   0xc   :  { %p509_p6 = por %p508_p5, %p507_p4 }
   0xe   :  { %p510_p7 = pnand %p509_p6, %p503_p3 }
  0x10   :  { %513 = shalt.err (!%p510_p7)
}
  0x11   :  { %s587_s28 = smov 64   ;;  %s588_s29 = smov 4  }
  0x12   :  { %34 = dma.hbm_to_vmem [thread:$0]  %s694_s1, 2048, %s29_s19, [#allocation7], %s587_s28, %s587_s28, %s588_s29  }
  0x13   :  { %s589_s7 = smov [#allocation3]   ;;  %s590_s9 = smov [#allocation8]  }
  0x14   :  { %s19_s8 = sshll.u32 %s589_s7, 4  ;;  %s42_s10 = sshll.u32 %s590_s9, 4  ;;  %s20_s8 = int_to_ptr.vmem [resolvable:$true] %s19_s8  ;;  %s43_s10 = int_to_ptr.vmem [resolvable:$true] %s42_s10 }
  0x15   :  { %s514_s13 = scalar_lea.hbm %s693_s0, 256 }
  0x16   :  { %p515_p8 = scmp.ne.s32.totalorder %s693_s0, %s514_s13  ;;  %p518_p9 = scmp.lt.u32.totalorder %s514_s13, %s693_s0 }
  0x18   :  { %p520_p10 = pnand %p518_p9, %p515_p8 }
  0x1a   :  { %523 = shalt.err (!%p520_p10)
}
  0x1b   :  { %s524_s1 = scalar_lea.vmem %s20_s8, 256  ;;  %p529_p12 = scmp.lt.s32.totalorder %s20_s8, %s20_s8 }
  0x1c   :  { %p525_p11 = scmp.ne.s32.totalorder %s20_s8, %s524_s1  ;;  %p530_p13 = scmp.lt.s32.totalorder %s524_s1, %s524_s1 }
  0x1e   :  { %p531_p0 = por %p530_p13, %p529_p12 }
  0x20   :  { %p532_p1 = pnand %p531_p0, %p525_p11 }
  0x22   :  { %535 = shalt.err (!%p532_p1)
}
  0x23   :  { %22 = dma.hbm_to_vmem [thread:$0]  %s693_s0, 256, %s20_s8, [#allocation4]  }
  0x24   :  { %s536_s22 = scalar_lea.hbm %s696_s3, 1024 }
  0x25   :  { %p537_p2 = scmp.ne.s32.totalorder %s696_s3, %s536_s22  ;;  %p540_p3 = scmp.lt.u32.totalorder %s536_s22, %s696_s3 }
  0x27   :  { %p542_p4 = pnand %p540_p3, %p537_p2 }
  0x29   :  { %545 = shalt.err (!%p542_p4)
}
  0x2a   :  { %s546_s27 = scalar_lea.vmem %s43_s10, 1024  ;;  %p551_p6 = scmp.lt.s32.totalorder %s43_s10, %s43_s10 }
  0x2b   :  { %p547_p5 = scmp.ne.s32.totalorder %s43_s10, %s546_s27  ;;  %p552_p7 = scmp.lt.s32.totalorder %s546_s27, %s546_s27 }
  0x2d   :  { %p553_p8 = por %p552_p7, %p551_p6 }
  0x2f   :  { %p554_p9 = pnand %p553_p8, %p547_p5 }
  0x31   :  { %557 = shalt.err (!%p554_p9)
}
  0x32   :  { %48 = dma.hbm_to_vmem [thread:$0]  %s696_s3, 1024, %s43_s10, [#allocation7], %s587_s28, %s587_s28, %s588_s29  }
  0x33   :  { %580 = dma.done.wait [#allocation4], 256  }
  0x34   :  { %581 = vsyncadd [#allocation4], 4294967040 }
  0x35   :  { %582 = dma.done.wait [#allocation7], 3072  }
  0x36   :  { %583 = vsyncadd [#allocation7], 4294964224  ;;  %v591_v0 = vmov 0.0   ;;  %v468_v1 = vld [vmem:[#allocation6 + $0x40] sm:$0xff]   ;;  %v470_v3 = vld [vmem:[#allocation6 + $0x48] sm:$0xff]   ;;  %vm592_vm0 = vmmov 0  }
  0x37   :  { %440 = vmatprep.subr.bf16.mxu1 %v591_v0  ;;  %v469_v2 = vld [vmem:[#allocation6] sm:$0xff]   ;;  %409 = vmatprep.subr.bf16.mxu0 %v468_v1  ;;  %v471_v4 = vld [vmem:[#allocation6 + $0x8] sm:$0xff]   ;;  %v472_v5 = vld [vmem:[#allocation6 + $0x50] sm:$0xff]   ;;  %s593_s7 = smov [#allocation9]  }
  0x38   :  { %410 = vmatpush3.bf16.msra.mxu0 %v469_v2  ;;  %v473_v6 = vld [vmem:[#allocation6 + $0x10] sm:$0xff]   ;;  %v474_v7 = vld [vmem:[#allocation6 + $0x58] sm:$0xff]   ;;  %v476_v9 = vld [vmem:[#allocation6 + $0x60] sm:$0xff]   ;;  %456 = vmatprep.mubr.msk.bf16.mxu1 %vm592_vm0, %v591_v0  ;;  %s373_s8 = sshll.u32 %s593_s7, 4  ;;  %s374_s8 = int_to_ptr.vmem [resolvable:$true] %s373_s8 }
  0x39   :  { %411 = vmatprep.subr.bf16.mxu0 %v470_v3  ;;  %v475_v8 = vld [vmem:[#allocation6 + $0x18] sm:$0xff]   ;;  %v477_v10 = vld [vmem:[#allocation6 + $0x20] sm:$0xff]   ;;  %v478_v11 = vld [vmem:[#allocation6 + $0x68] sm:$0xff]   ;;  %p563_p11 = scmp.lt.s32.totalorder %s374_s8, %s374_s8 }
  0x3a   :  { %v68_v12 = vld [vmem:[#allocation3 + $0x8] sm:$0xff]  ;;  %v484_v14 = vld [vmem:[#allocation8] sm:$0xff]   ;;  %v479_v15 = vld [vmem:[#allocation6 + $0x28] sm:$0xff]  }
  0x3b   :  { %v70_v13 = vpack.c.bf16 %v68_v12, %v68_v12  ;;  %v480_v16 = vld [vmem:[#allocation6 + $0x70] sm:$0xff]   ;;  %441 = vmatpush3.bf16.msra.mxu1 %v484_v14  ;;  %v485_v17 = vld [vmem:[#allocation8 + $0x8] sm:$0xff]   ;;  %v482_v19 = vld [vmem:[#allocation6 + $0x78] sm:$0xff]  }
  0x3c   :  { %412 = vmatpush3.bf16.msra.mxu0 %v471_v4  ;;  %442 = vmatprep.subr.bf16.mxu1 %v591_v0  ;;  %v481_v18 = vld [vmem:[#allocation6 + $0x30] sm:$0xff]   ;;  %v483_v21 = vld [vmem:[#allocation6 + $0x38] sm:$0xff]   ;;  %v488_v25 = vld [vmem:[#allocation8 + $0x20] sm:$0xff]  }
  0x3d   :  { %413 = vmatprep.subr.bf16.mxu0 %v472_v5  ;;  %231 = vmatprep.mubr.bf16.mxu0 %v70_v13  ;;  %v486_v20 = vld [vmem:[#allocation8 + $0x10] sm:$0xff]   ;;  %v487_v23 = vld [vmem:[#allocation8 + $0x18] sm:$0xff]   ;;  %v489_v26 = vld [vmem:[#allocation8 + $0x28] sm:$0xff]  }
  0x3e   :  { %v67_v22 = vld [vmem:[#allocation3] sm:$0xff]  ;;  %v491_v28 = vld [vmem:[#allocation8 + $0x38] sm:$0xff]  }
  0x3f   :  { %443 = vmatpush3.bf16.msra.mxu1 %v485_v17  ;;  %v69_v24 = vpack.c.bf16 %v67_v22, %v67_v22  ;;  %v490_v27 = vld [vmem:[#allocation8 + $0x30] sm:$0xff]  }
  0x40   :  { %414 = vmatpush3.bf16.msra.mxu0 %v473_v6  ;;  %444 = vmatprep.subr.bf16.mxu1 %v591_v0  ;;  %v399_v31 = vld [vmem:[%s695_s2] ss:$0 sm:$0xff]  ;;  %s558_s2 = scalar_lea.vmem %s374_s8, 128 }
  0x41   :  { %415 = vmatprep.subr.bf16.mxu0 %v474_v7  ;;  %v400_v38 = vld [vmem:[%s697_s4] ss:$0 sm:$0xff]  ;;  %p559_p10 = scmp.ne.s32.totalorder %s374_s8, %s558_s2  ;;  %p564_p12 = scmp.lt.s32.totalorder %s558_s2, %s558_s2 }
  0x43   :  { %445 = vmatpush3.bf16.msra.mxu1 %v486_v20  ;;  %p565_p13 = por %p564_p12, %p563_p11 }
  0x44   :  { %416 = vmatpush3.bf16.msra.mxu0 %v475_v8  ;;  %446 = vmatprep.subr.bf16.mxu1 %v591_v0 }
  0x45   :  { %417 = vmatprep.subr.bf16.mxu0 %v476_v9  ;;  %p566_p0 = pnand %p565_p13, %p559_p10 }
  0x47   :  { %447 = vmatpush3.bf16.msra.mxu1 %v487_v23 }
  0x48   :  { %418 = vmatpush3.bf16.msra.mxu0 %v477_v10  ;;  %448 = vmatprep.subr.bf16.mxu1 %v591_v0 }
  0x49   :  { %419 = vmatprep.subr.bf16.mxu0 %v478_v11 }
  0x4b   :  { %449 = vmatpush3.bf16.msra.mxu1 %v488_v25 }
  0x4c   :  { %420 = vmatpush3.bf16.msra.mxu0 %v479_v15  ;;  %450 = vmatprep.subr.bf16.mxu1 %v591_v0 }
  0x4d   :  { %421 = vmatprep.subr.bf16.mxu0 %v480_v16 }
  0x4f   :  { %451 = vmatpush3.bf16.msra.mxu1 %v489_v26 }
  0x50   :  { %422 = vmatpush3.bf16.msra.mxu0 %v481_v18  ;;  %452 = vmatprep.subr.bf16.mxu1 %v591_v0 }
  0x51   :  { %423 = vmatprep.subr.bf16.mxu0 %v482_v19 }
  0x53   :  { %453 = vmatpush3.bf16.msra.mxu1 %v490_v27 }
  0x54   :  { %424 = vmatpush3.bf16.msra.mxu0 %v483_v21  ;;  %454 = vmatprep.subr.bf16.mxu1 %v591_v0 }
  0x57   :  { %232 = vmatmul.mubr.bf16.vlgmr.msra.gmra.mrb[0].mxu0 %v69_v24  ;;  %455 = vmatpush3.bf16.msra.mxu1 %v491_v28 }
 0x12a   :  { %v425_v29 = vpop.f32.mrb[0].mxu0 }
 0x12b   :  { %v426_v30 = vpop.f32.mrb[1].mxu0 }
 0x12c   :  { %v427_v32 = vadd.f32 %v426_v30, %v425_v29  ;;  %v428_v33 = vpop.f32.mrb[2].mxu0 }
 0x12d   :  { %v429_v34 = vpop.f32.mrb[3].mxu0 }
 0x12e   :  { %v252_v35 = vadd.f32 %v427_v32, %v399_v31 }
 0x130   :  { %v253_v36 = vmax.f32 %v252_v35, 0.0 }
 0x132   :  { %v254_v37 = vpack.c.bf16 %v253_v36, %v253_v36 }
 0x134   :  { %457 = vmatmul.mubr.bf16.vlgmr.msra.gmra.mrb[0].mxu1 %v254_v37 }
 0x207   :  { %v360_v39 = vpop.f32.mrb[0].mxu1 }
 0x208   :  { %v361_v40 = vadd.f32 %v400_v38, %v360_v39  ;;  %v458_v41 = vpop.f32.mrb[1].mxu1 }
 0x209   :  { %v363_v42 = vpop.f32.mrb[2].mxu1 }
 0x20a   :  { %366 = vst [vmem:[#allocation9] sm:$0xff] %v361_v40  ;;  %v459_v43 = vpop.f32.mrb[3].mxu1 }
 0x20b   :  { %569 = shalt.err (!%p566_p0)
}
 0x20c   :  { %s570_s4 = scalar_lea.hbm %s698_s5, 128 }
 0x20d   :  { %p571_p1 = scmp.ne.s32.totalorder %s698_s5, %s570_s4  ;;  %p574_p2 = scmp.lt.u32.totalorder %s570_s4, %s698_s5 }
 0x20f   :  { %p576_p3 = pnand %p574_p2, %p571_p1 }
 0x211   :  { %579 = shalt.err (!%p576_p3)
}
 0x212   :  { %376 = dma.vmem_to_hbm [thread:$0]  %s374_s8, 128, %s698_s5, [#allocation5]  }
 0x213   :  { %584 = dma.done.wait [#allocation5], 128  }
 0x214   :  { %585 = vsyncadd [#allocation5], 4294967168 }
 0x215   :  { %380 = vsyncpa [#allocation4], 1 }
 0x216   :  { %381 = vsyncpa [#allocation7], 1 }
 0x217   :  { %382 = vsyncpa [#allocation5], 1 }

</bundles_post_ra>
